<compile_context>
chip_gen: v7x
topology: tpu7x:2x2x1
jax: 0.10.0
libtpu: 0.0.40
codegen_flags: <defaults>
</compile_context>

<pallas_src>
import jax
import jax.numpy as jnp
from jax.experimental import pallas as pl
from jax.experimental.pallas import tpu as pltpu


LANE = 128      # lane width of a vreg / output lane-density target
SUBLANE = 8     # sublane count of a vreg / batch padding target


def _round_up(x, mult):
    return ((x + mult - 1) // mult) * mult


def _pick_tile(dim, candidates):
    """Largest candidate tile that evenly divides `dim` (dim is pre-padded)."""
    for c in candidates:
        if dim % c == 0:
            return c
    return dim


def _mrl_fused_kernel(x_ref, w_ref, b_ref, o_ref, acc_ref):
    # x_ref: (tm, tk) bf16   w_ref: (tk, tn) bf16
    # b_ref: (1, tn)  f32    o_ref: (tm, tn) f32   acc_ref: (tm, tn) f32 scratch
    k = pl.program_id(2)

    @pl.when(k == 0)
    def _():
        # Fold bias into the accumulator init -> no separate epilogue VPU add.
        acc_ref[...] = jnp.broadcast_to(b_ref[...], acc_ref.shape).astype(jnp.float32)

    acc_ref[...] += jnp.dot(x_ref[...], w_ref[...],
                            preferred_element_type=jnp.float32)

    @pl.when(k == pl.num_programs(2) - 1)
    def _():
        o_ref[...] = acc_ref[...].astype(o_ref.dtype)


def mrl_fused_matmul(x_pad, w_stacked, b_stacked):
    """One fused y = x_pad @ w_stacked + b_stacked over all doll heads.

    x_pad     : (B_pad, K_pad)  bf16 (or f32), B_pad % 8 == 0, K_pad % 128 == 0
    w_stacked : (K_pad, N_pad)  bf16 (or f32), N_pad % 128 == 0
    b_stacked : (1, N_pad)      f32
    returns   : (B_pad, N_pad)  f32
    """
    B_pad, K_pad = x_pad.shape
    K2, N_pad = w_stacked.shape
    assert K2 == K_pad and b_stacked.shape == (1, N_pad)

    # Tile sizes: lane/MXU aligned, capped so double-buffered lhs/rhs + f32
    # accumulator stay comfortably inside v7x's smaller VMEM budget.
    tm = _pick_tile(B_pad, (256, 128, 64, 32, 16, 8))
    tn = _pick_tile(N_pad, (256, 128))
    tk = _pick_tile(K_pad, (512, 256, 128))
    grid = (B_pad // tm, N_pad // tn, K_pad // tk)

    bytes_accessed = (x_pad.size * x_pad.dtype.itemsize
                      + w_stacked.size * w_stacked.dtype.itemsize
                      + b_stacked.size * b_stacked.dtype.itemsize
                      + B_pad * N_pad * 4)
    cost = pl.CostEstimate(flops=2 * B_pad * K_pad * N_pad,
                           transcendentals=0,
                           bytes_accessed=bytes_accessed)

    return pl.pallas_call(
        _mrl_fused_kernel,
        out_shape=jax.ShapeDtypeStruct((B_pad, N_pad), jnp.float32),
        grid_spec=pltpu.PrefetchScalarGridSpec(
            num_scalar_prefetch=0,
            grid=grid,
            in_specs=[
                pl.BlockSpec((tm, tk), lambda i, j, k: (i, k)),   # x
                pl.BlockSpec((tk, tn), lambda i, j, k: (k, j)),   # stacked W^T
                pl.BlockSpec((1, tn), lambda i, j, k: (0, j)),    # bias (K-invariant)
            ],
            out_specs=pl.BlockSpec((tm, tn), lambda i, j, k: (i, j)),
            scratch_shapes=[pltpu.VMEM((tm, tn), jnp.float32)],
        ),
        compiler_params=pltpu.CompilerParams(
            dimension_semantics=("parallel", "parallel", "arbitrary"),
            vmem_limit_bytes=32 * 1024 * 1024,
        ),
        cost_estimate=cost,
    )(x_pad, w_stacked, b_stacked)


class MRLLayerPallas:
    """JAX/Pallas equivalent of the PyTorch MRLLayer module (fused heads)."""

    def __init__(self, num_classes, m, key, compute_dtype=jnp.bfloat16):
        self.m = tuple(m)
        self.num_classes = num_classes
        self.compute_dtype = compute_dtype

        # Per-doll parameters with torch.nn.Linear-style init
        # (kept in torch layout for the reference check).
        self.params = {}
        for doll in self.m:
            key, kw, kb = jax.random.split(key, 3)
            bound = 1.0 / (doll ** 0.5)
            w = jax.random.uniform(kw, (num_classes, doll),
                                   minval=-bound, maxval=bound,
                                   dtype=jnp.float32)
            b = jax.random.uniform(kb, (num_classes,),
                                   minval=-bound, maxval=bound,
                                   dtype=jnp.float32)
            self.params[doll] = (w, b)

        # ---- Build the fused operands ONCE at construction time ----
        self.d_max = max(self.m)
        self.c_pad = _round_up(num_classes, LANE)       # lane-dense per-doll slot
        self.k_pad = _round_up(self.d_max, LANE)        # K padded for 128 tiling
        n_pad = self.c_pad * len(self.m)

        # Explicit zero init (exactness of the padding relies on it).
        w_stacked = jnp.zeros((self.k_pad, n_pad), dtype=jnp.float32)
        b_stacked = jnp.zeros((1, n_pad), dtype=jnp.float32)
        for j, doll in enumerate(self.m):
            w, b = self.params[doll]
            col0 = j * self.c_pad
            w_stacked = w_stacked.at[:doll, col0:col0 + num_classes].set(w.T)
            b_stacked = b_stacked.at[0, col0:col0 + num_classes].set(b)

        self.w_stacked = w_stacked.astype(compute_dtype)   # bf16 MXU input
        self.b_stacked = b_stacked                          # bias stays f32

    def __call__(self, x):
        B, H = x.shape
        b_pad = _round_up(max(B, SUBLANE), SUBLANE)

        # Slice features to what the heads use and zero-pad to (B_pad, K_pad).
        # Weight rows beyond each doll's d are zero, so the padding is exact.
        k_used = min(H, self.k_pad)
        x_pad = jnp.zeros((b_pad, self.k_pad), dtype=self.compute_dtype)
        x_pad = x_pad.at[:B, :k_used].set(x[:, :k_used].astype(self.compute_dtype))

        y = mrl_fused_matmul(x_pad, self.w_stacked, self.b_stacked)  # (B_pad, N_pad) f32

        # Wrapper-side slicing back to per-doll logits (matches torch forward).
        outs = []
        for j in range(len(self.m)):
            col0 = j * self.c_pad
            outs.append(y[:B, col0:col0 + self.num_classes])
        return outs


if __name__ == "__main__":
    key = jax.random.PRNGKey(0)
    key, kx, kp = jax.random.split(key, 3)

    batch = 2
    hidden = 32
    num_classes = 10
    m = (8, 16, 32)

    x = jax.random.normal(kx, (batch, hidden), dtype=jnp.float32)

    layer = MRLLayerPallas(num_classes, m, kp)
    outs = layer(x)
    outs = [jax.block_until_ready(o) for o in outs]

    # Sanity check against the plain-JAX f32 reference of the same math.
    # bf16 MXU inputs with f32 accumulation -> loosened tolerance.
    for doll, o in zip(m, outs):
        w, b = layer.params[doll]
        ref = x[:, :doll] @ w.T + b
        assert o.shape == (batch, num_classes)
        assert jnp.allclose(o, ref, atol=5e-2, rtol=5e-2), (
            doll, float(jnp.max(jnp.abs(o - ref))))

    print("KERNEL_OK")
</pallas_src>

<mosaic_0001>
module attributes {stable_mosaic.version = 11 : i64} {
  func.func @_mrl_fused_kernel(%arg0: i32, %arg1: i32, %arg2: i32, %arg3: memref<8x128xbf16, #tpu.memory_space<vmem>>, %arg4: memref<128x128xbf16, #tpu.memory_space<vmem>>, %arg5: memref<1x128xf32, #tpu.memory_space<vmem>>, %arg6: memref<8x128xf32, #tpu.memory_space<vmem>>, %arg7: memref<8x128xf32, #tpu.memory_space<vmem>>) attributes {dimension_semantics = [#tpu.dimension_semantics<parallel>, #tpu.dimension_semantics<parallel>, #tpu.dimension_semantics<arbitrary>], iteration_bounds = array<i64: 1, 3, 1>, scalar_prefetch = 0 : i64, scratch_operands = 1 : i64, tpu.core_type = #tpu.core_type<tc>, window_params = [{transform_indices = @transform_0, window_bounds = array<i64: 8, 128>}, {transform_indices = @transform_1, window_bounds = array<i64: 128, 128>}, {transform_indices = @transform_2, window_bounds = array<i64: 1, 128>}, {transform_indices = @transform_3, window_bounds = array<i64: 8, 128>}]} {
    %c0_i32 = arith.constant 0 : i32
    %0 = arith.cmpi eq, %arg2, %c0_i32 : i32
    %1 = arith.extui %0 : i1 to i32
    %c0_i32_0 = arith.constant 0 : i32
    %2 = arith.cmpi ne, %1, %c0_i32_0 : i32
    scf.if %2 {
      %c0_10 = arith.constant 0 : index
      %c0_11 = arith.constant 0 : index
      %12 = vector.load %arg5[%c0_10, %c0_11] : memref<1x128xf32, #tpu.memory_space<vmem>>, vector<1x128xf32>
      %13 = vector.shape_cast %12 : vector<1x128xf32> to vector<1x128xf32>
      %14 = vector.broadcast %13 : vector<1x128xf32> to vector<8x128xf32>
      %c0_12 = arith.constant 0 : index
      %c0_13 = arith.constant 0 : index
      %15 = vector.load %arg7[%c0_12, %c0_13] : memref<8x128xf32, #tpu.memory_space<vmem>>, vector<8x128xf32>
      tpu.vector_store %arg7[%c0_12, %c0_13], %14 {strides = array<i32>} : memref<8x128xf32, #tpu.memory_space<vmem>>, vector<8x128xf32>,
    } else {
    }
    %c0 = arith.constant 0 : index
    %c0_1 = arith.constant 0 : index
    %3 = vector.load %arg7[%c0, %c0_1] : memref<8x128xf32, #tpu.memory_space<vmem>>, vector<8x128xf32>
    %c0_2 = arith.constant 0 : index
    %c0_3 = arith.constant 0 : index
    %4 = vector.load %arg3[%c0_2, %c0_3] : memref<8x128xbf16, #tpu.memory_space<vmem>>, vector<8x128xbf16>
    %c0_4 = arith.constant 0 : index
    %c0_5 = arith.constant 0 : index
    %5 = vector.load %arg4[%c0_4, %c0_5] : memref<128x128xbf16, #tpu.memory_space<vmem>>, vector<128x128xbf16>
    %cst = arith.constant dense<0.000000e+00> : vector<8x128xf32>
    %6 = tpu.matmul %4, %5, %cst {dimension_numbers = #tpu.dot_dimension_numbers<[1], [0], [0], [1], [0, 0, 1, 1], [], []>} : vector<8x128xbf16>, vector<128x128xbf16>, vector<8x128xf32> -> vector<8x128xf32>
    %7 = arith.addf %3, %6 : vector<8x128xf32>
    %c0_6 = arith.constant 0 : index
    %c0_7 = arith.constant 0 : index
    %8 = vector.load %arg7[%c0_6, %c0_7] : memref<8x128xf32, #tpu.memory_space<vmem>>, vector<8x128xf32>
    tpu.vector_store %arg7[%c0_6, %c0_7], %7 {strides = array<i32>} : memref<8x128xf32, #tpu.memory_space<vmem>>, vector<8x128xf32>,
    %c0_i32_8 = arith.constant 0 : i32
    %9 = arith.cmpi eq, %arg2, %c0_i32_8 : i32
    %10 = arith.extui %9 : i1 to i32
    %c0_i32_9 = arith.constant 0 : i32
    %11 = arith.cmpi ne, %10, %c0_i32_9 : i32
    scf.if %11 {
      %c0_10 = arith.constant 0 : index
      %c0_11 = arith.constant 0 : index
      %12 = vector.load %arg7[%c0_10, %c0_11] : memref<8x128xf32, #tpu.memory_space<vmem>>, vector<8x128xf32>
      %c0_12 = arith.constant 0 : index
      %c0_13 = arith.constant 0 : index
      %13 = vector.load %arg6[%c0_12, %c0_13] : memref<8x128xf32, #tpu.memory_space<vmem>>, vector<8x128xf32>
      tpu.vector_store %arg6[%c0_12, %c0_13], %12 {strides = array<i32>} : memref<8x128xf32, #tpu.memory_space<vmem>>, vector<8x128xf32>,
    } else {
    }
    return
  }
  func.func @transform_0(%arg0: i32, %arg1: i32, %arg2: i32) -> (i32, i32) {
    %c0_i32 = arith.constant 0 : i32
    return %arg0, %arg2 : i32, i32
  }
  func.func @transform_1(%arg0: i32, %arg1: i32, %arg2: i32) -> (i32, i32) {
    %c0_i32 = arith.constant 0 : i32
    return %arg2, %arg1 : i32, i32
  }
  func.func @transform_2(%arg0: i32, %arg1: i32, %arg2: i32) -> (i32, i32) {
    %c0_i32 = arith.constant 0 : i32
    %c0_i32_0 = arith.constant 0 : i32
    return %c0_i32, %arg1 : i32, i32
  }
  func.func @transform_3(%arg0: i32, %arg1: i32, %arg2: i32) -> (i32, i32) {
    %c0_i32 = arith.constant 0 : i32
    return %arg0, %arg1 : i32, i32
  }
}

</mosaic_0001>

<bundles_post_ra>
// kernel: tpu_custom_call.1
= control target key start
LH: loop header
LB: loop body
LE: loop exit
PB: predicated region body
PF: predicated region fallthrough
CT: control target
= control target key end

     0   :  { %8 = vsyncpa [#allocation4], 0  ;;  %s1039_s0 = inlined_call_operand.hbm [shape: bf16[8,128], index: 0, kind: input, shape index: {}]   ;;  %s1040_s1 = inlined_call_operand.hbm [shape: bf16[128,384], index: 1, kind: input, shape index: {}]   ;;  %s1041_s2 = inlined_call_operand.vmem [shape: f32[1,384], index: 2, kind: input, shape index: {}]   ;;  %s1042_s3 = inlined_call_operand.hbm [shape: f32[8,384], index: 3, kind: output, shape index: {}]  }
   0x1   :  { %9 = vsyncpa [#allocation7], 0 }
   0x2   :  { %11 = vsyncpa [#allocation7 + $0x1], 0 }
   0x3   :  { %12 = vsyncpa [#allocation5], 0 }
   0x4   :  { %14 = vsyncpa [#allocation5 + $0x1], 0  ;;  %s816_s12 = smov 0   ;;  %s818_s13 = smov 0  }
   0x5   :  { %s820_s14 = smov 0   ;;  %s822_s15 = smov 0  }
   0x6   :  { %s824_s16 = smov 0   ;;  %s826_s17 = smov 0  }
   0x7 LB: > { %s503_s18 = sadd.s32 4294967295, %s786_s17   ;;  %s504_s19 = sadd.s32 4294967294, %s786_s17   ;;  %s786_s17 = sphi %s826_s17, %s20_s17   ;;  %s782_s16 = sphi %s824_s16, %s1069_s16   ;;  %s778_s15 = sphi %s822_s15, %s1068_s15   ;;  %s774_s14 = sphi %s820_s14, %s1067_s14   ;;  %s770_s13 = sphi %s818_s13, %s1066_s13   ;;  %s766_s12 = sphi %s816_s12, %s1065_s12  }
   0x8   : > { %s76_s20 = sadd.s32 1, %s774_s14  ;;  %p83_p0 = scmp.ne.s32.totalorder %s774_s14, %s770_s13 }
   0x9   : > { %p84_p1 = scmp.eq.s32.totalorder %s786_s17, 0  ;;  %p89_p2 = scmp.ne.s32.totalorder %s770_s13, %s766_s12 }
   0xa   : > { %p854_p3 = scmp.eq.s32.totalorder %s503_s18, 0  ;;  %p141_p4 = scmp.eq.s32.totalorder %s503_s18, 2 }
   0xb   : > { %p858_p5 = por %p84_p1, %p83_p0  ;;  %p147_p6 = scmp.eq.s32.totalorder %s504_s19, 2 }
   0xc   : > { %s1049_s21 = scalar_select %p854_p3, 1, 0 }
   0xd   : > { %p864_p7 = por %p854_p3, %p89_p2  ;;  %p868_p8 = por %p141_p4, %p83_p0 }
   0xe   : > { %p872_p9 = por %p147_p6, %p89_p2  ;;  %p505_p10 = scmp.ge.s32.totalorder %s786_s17, 1 }
   0xf   : > { %s1051_s23 = scalar_select %p864_p7, 1, 0 }
  0x10   : > { %s1052_s24 = scalar_select %p868_p8, 1, 0 }
  0x11   : > { %s1053_s25 = scalar_select %p872_p9, 1, 0 }
  0x12   : > { %p154_p11 = scmp.lt.s32.totalorder %s786_s17, 4  ;;  %s788_s27 = smov [#allocation3]  }
  0x13   : > { %s170_s28 = sshll.u32 %s788_s27, 4  ;;  %p577_p13 = scmp.lt.s32.totalorder %s786_s17, 3  ;;  %s171_s28 = int_to_ptr.vmem [resolvable:$true] %s170_s28 }
  0x14   : > { %p878_p12 = pnand %p505_p10, %p154_p11  ;;  %s35_s4 = sadd.s32 1, %s782_s16 }
  0x15   : > { %p887_p1 = pnand %p577_p13, %p858_p5  ;;  %p898_p4 = scmp.ge.s32.totalorder %s35_s4, 3 }
  0x16   : > { %s1054_s26 = scalar_select %p878_p12, 1, 0 }
  0x17   : > { %p564_p0 = pneg %p878_p12  ;;  %s181_s6 = sand.u32 1, %s774_s14  }
  0x18   : > { %s1055_s29 = scalar_select %p887_p1, 1, 0 }
  0x19   : > { %p893_p2 = pnand %p564_p0, %p854_p3  ;;  %s642_s9 = scalar_lea.hbm %s1039_s0, 64 }
  0x1a   : > { %s1057_s5 = scalar_select %p898_p4, 1, 0 }
  0x1b   : > { %p643_p5 = scmp.ne.s32.totalorder %s1039_s0, %s642_s9  ;;  %p644_p6 = pneg %p893_p2 }
  0x1c   : > { %p649_p13 = scmp.lt.u32.totalorder %s642_s9, %s1039_s0 }
  0x1d   : > { %p645_p10 = pnand %p644_p6, %p643_p5 }
  0x1f   : > { %p646_p11 = pneg %p645_p10 }
  0x21   : > { %p651_p0 = pnand %p649_p13, %p646_p11 }
  0x23   : > { %654 = shalt.err (!%p651_p0)
}
  0x24   : > { %s655_s22 = scalar_lea.vmem %s171_s28, 64  ;;  %p663_p3 = scmp.lt.s32.totalorder %s171_s28, %s171_s28 }
  0x25   : > { %p656_p9 = scmp.ne.s32.totalorder %s171_s28, %s655_s22  ;;  %p664_p12 = scmp.lt.s32.totalorder %s655_s22, %s655_s22 }
  0x27   : > { %p658_p8 = pnand %p656_p9, %p644_p6  ;;  %p665_p1 = por %p664_p12, %p663_p3 }
  0x29   : > { %p659_p7 = pneg %p658_p8 }
  0x2b   : > { %p666_p4 = pnand %p665_p1, %p659_p7 }
  0x2d   : > { %669 = shalt.err (!%p666_p4)
}
  0x2e   : > { %567 = dma.hbm_to_vmem [thread:$0]  (!%p893_p2), %s1039_s0, 64, %s171_s28, [#allocation4]  }
  0x2f   : > { %p1058_p9 = scmp.ne.s32.totalorder %s1057_s5, 0  ;;  %s508_s8 = sshll.u32 %s181_s6, 6 }
  0x30   : > { %s509_s10 = sshll.u32 %s782_s16, 6  ;;  %s185_s19 = scalar_lea.vmem [#allocation6], %s508_s8 }
  0x31   : > { %s1071_s4 = smov (%p1058_p9, %s35_s4), 0  ;;  %s929_s18 = scalar_lea.hbm %s1040_s1, %s509_s10 }
  0x32   : > { %s72_s9 = ssub.s32 %s782_s16, %s1071_s4  ;;  %s194_s22 = sshll.u32 %s185_s19, 4  ;;  %s936_s22 = int_to_ptr.vmem [resolvable:$true] %s194_s22 }
  0x33   : > { %p74_p3 = scmp.eq.s32.totalorder %s72_s9, 0  ;;  %s938_s5 = scalar_lea.sflag [#allocation7], %s181_s6 }
  0x34   : > { %s670_s27 = scalar_lea.hbm %s929_s18, 1024  ;;  %p1059_p8 = scmp.ne.s32.totalorder %s1055_s29, 0 }
  0x35   : > { %s934_s28 = scalar_select %p74_p3, %s774_s14, %s76_s20  }
  0x36   : > { %p671_p7 = scmp.ne.s32.totalorder %s929_s18, %s670_s27  ;;  %p672_p12 = pneg %p1059_p8 }
  0x37   : > { %s675_s8 = scalar_lea.hbm %s1040_s1, 3072  ;;  %p676_p4 = scmp.lt.u32.totalorder %s929_s18, %s1040_s1 }
  0x38   : > { %p673_p1 = pnand %p672_p12, %p671_p7  ;;  %p677_p5 = scmp.lt.u32.totalorder %s675_s8, %s670_s27 }
  0x39   : > { %p679_p10 = scmp.lt.u32.totalorder %s670_s27, %s929_s18 }
  0x3a   : > { %p674_p2 = pneg %p673_p1  ;;  %p678_p6 = por %p677_p5, %p676_p4 }
  0x3c   : > { %p680_p11 = por %p679_p10, %p678_p6 }
  0x3e   : > { %p681_p13 = pnand %p680_p11, %p674_p2 }
  0x40   : > { %684 = shalt.err (!%p681_p13)
}
  0x41   : > { %s685_s20 = scalar_lea.vmem %s936_s22, 1024  ;;  %s789_s6 = smov [#allocation6]  }
  0x42   : > { %p686_p0 = scmp.ne.s32.totalorder %s936_s22, %s685_s20  ;;  %s690_s11 = sshll.u32 %s789_s6, 4  ;;  %s691_s11 = int_to_ptr.vmem [resolvable:$false] %s690_s11 }
  0x43   : > { %s692_s19 = scalar_lea.vmem %s691_s11, 2048  ;;  %p693_p7 = scmp.lt.s32.totalorder %s936_s22, %s691_s11 }
  0x44   : > { %p688_p9 = pnand %p686_p0, %p672_p12  ;;  %p694_p1 = scmp.lt.s32.totalorder %s692_s19, %s685_s20 }
  0x46   : > { %p689_p3 = pneg %p688_p9  ;;  %p695_p4 = por %p694_p1, %p693_p7 }
  0x48   : > { %p696_p5 = pnand %p695_p4, %p689_p3 }
  0x4a   : > { %699 = shalt.err (!%p696_p5)
}
  0x4b   : > { %s790_s27 = smov 192   ;;  %s791_s7 = smov 64  }
  0x4c   : > { %s792_s9 = smov 4   ;;  %p1060_p12 = scmp.ne.s32.totalorder %s1054_s26, 0 }
  0x4d   : > { %571 = dma.hbm_to_vmem [thread:$0]  (!%p1059_p8), %s929_s18, 1024, %s936_s22, %s938_s5, %s790_s27, %s791_s7, %s792_s9  }
  0x4e   : > { %212 = sbr.rel (%p1060_p12) target bundleno = 351 (0x15f), region = 32  ;;  %p1061_p2 = scmp.ne.s32.totalorder (!%p1060_p12), %s1049_s21, 0 }
  0x55   : > { %753 = dma.done.wait (%p1061_p2), [#allocation4], 64  }
  0x56   : > { %755 = vsyncadd (%p1061_p2), [#allocation4], 4294967232  ;;  %s973_s8 = sand.u32 1, %s770_s13   ;;  %p1062_p6 = scmp.ne.s32.totalorder %s1051_s23, 0 }
  0x57   : > { %s512_s10 = sshll.u32 %s973_s8, 6  ;;  %s219_s30 = scalar_lea.sflag [#allocation7], %s973_s8 }
  0x58   : > { %s222_s20 = scalar_lea.vmem [#allocation6], %s512_s10 }
  0x59   : > { %757 = dma.done.wait (%p1062_p6), %s219_s30, 1024  }
  0x5a   : > { %759 = vsyncadd (%p1062_p6), %s219_s30, 4294966272  ;;  %v793_v0 = vmov 0.0   ;;  %vm794_vm0 = vmmov 0   ;;  %v634_v1 = vld [vmem:[%s222_s20] sm:$0xff]   ;;  %v635_v2 = vld [vmem:[%s222_s20 + $0x8] sm:$0xff]   ;;  %p249_p8 = scmp.lt.s32.totalorder %s778_s15, 2 }
  0x5b   : > { %536 = vmatprep.subr.bf16.mxu0 %v793_v0  ;;  %552 = vmatprep.mubr.msk.bf16.mxu0 %vm794_vm0, %v793_v0  ;;  %v636_v3 = vld [vmem:[%s222_s20 + $0x10] sm:$0xff]   ;;  %v637_v4 = vld [vmem:[%s222_s20 + $0x18] sm:$0xff]   ;;  %v638_v5 = vld [vmem:[%s222_s20 + $0x20] sm:$0xff]   ;;  %s513_s23 = sshll.u32 %s973_s8, 3  ;;  %s524_s22 = sshll.u32 %s778_s15, 7 }
  0x5c   : > { %537 = vmatpush3.bf16.msra.mxu0 %v634_v1  ;;  %v639_v6 = vld [vmem:[%s222_s20 + $0x28] sm:$0xff]   ;;  %v640_v7 = vld [vmem:[%s222_s20 + $0x30] sm:$0xff]   ;;  %v641_v8 = vld [vmem:[%s222_s20 + $0x38] sm:$0xff]   ;;  %s250_s21 = scalar_select %p249_p8, %s778_s15, 2 }
  0x5d   : > { %538 = vmatprep.subr.bf16.mxu0 %v793_v0  ;;  %v266_v9 = vld [vmem:[#allocation3] sm:$0xf]  ;;  %s247_s5 = scalar_lea.vmem [#allocation8], %s513_s23  ;;  %s991_s27 = scalar_lea.hbm %s1042_s3, %s524_s22 }
  0x5e   : > { %s251_s18 = scalar_lea.vmem %s1041_s2, %s250_s21  ;;  %s394_s6 = sshll.u32 %s247_s5, 4  ;;  %s993_s6 = int_to_ptr.vmem [resolvable:$true] %s394_s6 }
  0x5f   : > { %v514_v10 = vld [vmem:[%s251_s18] ss:$0 sm:$0xff]  ;;  %s379_s7 = scalar_lea.sflag [#allocation5], %s973_s8  ;;  %s700_s15 = scalar_lea.vmem %s993_s6, 128 }
  0x60   : > { %539 = vmatpush3.bf16.msra.mxu0 %v635_v2  ;;  %p701_p10 = scmp.ne.s32.totalorder %s993_s6, %s700_s15  ;;  %p1063_p11 = scmp.ne.s32.totalorder %s1052_s24, 0 }
  0x61   : > { %540 = vmatprep.subr.bf16.mxu0 %v793_v0  ;;  %s795_s9 = smov [#allocation8]  }
  0x62   : > { %p702_p13 = pnand %p701_p10, %p1063_p11  ;;  %s704_s10 = sshll.u32 %s795_s9, 4  ;;  %s705_s10 = int_to_ptr.vmem [resolvable:$false] %s704_s10 }
  0x63   : > { %s706_s30 = scalar_lea.vmem %s705_s10, 256  ;;  %p707_p9 = scmp.lt.s32.totalorder %s993_s6, %s705_s10 }
  0x64   : > { %541 = vmatpush3.bf16.msra.mxu0 %v636_v3  ;;  %p703_p0 = pneg %p702_p13  ;;  %p708_p3 = scmp.lt.s32.totalorder %s706_s30, %s700_s15 }
  0x65   : > { %542 = vmatprep.subr.bf16.mxu0 %v793_v0 }
  0x66   : > { %p709_p7 = por %p708_p3, %p707_p9 }
  0x68   : > { %543 = vmatpush3.bf16.msra.mxu0 %v637_v4  ;;  %p710_p1 = pnand %p709_p7, %p703_p0 }
  0x69   : > { %544 = vmatprep.subr.bf16.mxu0 %v793_v0 }
  0x6c   : > { %545 = vmatpush3.bf16.msra.mxu0 %v638_v5 }
  0x6d   : > { %546 = vmatprep.subr.bf16.mxu0 %v793_v0 }
  0x70   : > { %547 = vmatpush3.bf16.msra.mxu0 %v639_v6 }
  0x71   : > { %548 = vmatprep.subr.bf16.mxu0 %v793_v0 }
  0x74   : > { %549 = vmatpush3.bf16.msra.mxu0 %v640_v7 }
  0x75   : > { %550 = vmatprep.subr.bf16.mxu0 %v793_v0 }
  0x78   : > { %551 = vmatpush3.bf16.msra.mxu0 %v641_v8 }
  0x7b   : > { %553 = vmatmul.mubr.bf16.vlgmr.msra.gmra.mrb[0].mxu0 %v266_v9 }
 0x14e   : > { %v365_v11 = vpop.f32.mrb[0].mxu0 }
 0x14f   : > { %v371_v12 = vadd.f32 %v514_v10, %v365_v11  ;;  %v554_v13 = vpop.f32.mrb[1].mxu0 }
 0x150   : > { %v368_v14 = vpop.f32.mrb[2].mxu0 }
 0x151   : > { %377 = vst [vmem:[%s247_s5] sm:$0xff] %v371_v12  ;;  %v555_v15 = vpop.f32.mrb[3].mxu0 }
 0x152   : > { %713 = shalt.err (!%p710_p1)
}
 0x153   : > { %s714_s8 = scalar_lea.hbm %s991_s27, 128  ;;  %s718_s23 = scalar_lea.hbm %s1042_s3, 384 }
 0x154   : > { %p715_p4 = scmp.ne.s32.totalorder %s991_s27, %s714_s8  ;;  %p719_p2 = scmp.lt.u32.totalorder %s991_s27, %s1042_s3 }
 0x155   : > { %p720_p6 = scmp.lt.u32.totalorder %s718_s23, %s714_s8  ;;  %p722_p10 = scmp.lt.u32.totalorder %s714_s8, %s991_s27 }
 0x156   : > { %p716_p5 = pnand %p715_p4, %p1063_p11 }
 0x157   : > { %p721_p8 = por %p720_p6, %p719_p2 }
 0x158   : > { %p717_p12 = pneg %p716_p5 }
 0x159   : > { %p723_p13 = por %p722_p10, %p721_p8 }
 0x15b   : > { %p724_p0 = pnand %p723_p13, %p717_p12 }
 0x15d   : > { %727 = shalt.err (!%p724_p0)
}
 0x15e   : > { %562 = dma.vmem_to_hbm [thread:$0]  (%p1063_p11), %s993_s6, 128, %s991_s27, %s379_s7  }
 0x15f PF: > { %p579_p9 = scmp.ge.s32.totalorder %s786_s17, 2  ;;  %s406_s18 = sand.u32 1, %s766_s12  }
 0x160   : > { %p1064_p3 = scmp.ne.s32.totalorder %s1053_s25, 0  ;;  %s407_s22 = scalar_lea.sflag [#allocation5], %s406_s18 }
 0x162   : > { %p573_p7 = pnand %p579_p9, %p1064_p3 }
 0x164   : > { %761 = dma.done.wait (!%p573_p7), %s407_s22, 128  }
 0x165   : > { %763 = vsyncadd (!%p573_p7), %s407_s22, 4294967168  ;;  %s20_s17 = sadd.s32 1, %s786_s17   ;;  %s1065_s12 = smov %s770_s13 }
 0x166   : > { %p17_p1 = scmp.ge.s32.totalorder %s20_s17, 5   ;;  %s1066_s13 = smov %s774_s14 }
 0x167   : > { %s1067_s14 = smov %s934_s28  ;;  %s1068_s15 = smov %s782_s16 }
 0x168   : > { %s1069_s16 = smov %s1071_s4  ;;  %19 = sbr.rel (!%p17_p1) target bundleno = 7 (0x7), region = 94 }
 0x16f   :  { %412 = vsyncpa [#allocation4], 1 }
 0x170   :  { %414 = vsyncpa [#allocation4 + $0x1], 1 }
 0x171   :  { %415 = vsyncpa [#allocation7], 1 }
 0x172   :  { %417 = vsyncpa [#allocation7 + $0x1], 1 }
 0x173   :  { %418 = vsyncpa [#allocation5], 1 }
 0x174   :  { %420 = vsyncpa [#allocation5 + $0x1], 1 }

</bundles_post_ra>
